<compile_context>
chip_gen: v6e
topology: v6e:2x2x1
jax: 0.10.0
libtpu: 0.0.40
codegen_flags: <defaults>
</compile_context>

<pallas_src>
import functools

import jax
import jax.numpy as jnp
import numpy as np
from jax.experimental import pallas as pl
from jax.experimental.pallas import tpu as pltpu


def _wave_source_kernel(xs_ref, ys_ref, amp_ref, y_ref, out_ref, *, tile_h, n_src):
    """One grid step = one (row_tile, W) slab of one batch element.

    xs_ref, ys_ref : SMEM int32 [S]      source coordinates
    amp_ref        : SMEM f32   [B, S]   dt**2 * X (pre-scaled amplitudes)
    y_ref, out_ref : VMEM       [tile_h, W]  (batch dim squeezed by BlockSpec)
    """
    b = pl.program_id(0)
    row0 = pl.program_id(1) * tile_h
    _, W = y_ref.shape

    # 1) Stream copy — the only work the vast majority of tiles do.
    out_ref[...] = y_ref[...]

    # 2) Sparse injection: one masked row update per source that lands in this
    #    tile; pl.when skips everything for source-free tiles.
    def _inject(s):
        xs = xs_ref[s]
        ys = ys_ref[s]

        @pl.when((xs >= row0) & (xs < row0 + tile_h))
        def _():
            xl = xs - row0                                        # local sublane row
            cols = jax.lax.broadcasted_iota(jnp.int32, (1, W), 1)
            amp = amp_ref[b, s].astype(y_ref.dtype)
            y_row = y_ref[pl.ds(xl, 1), :]                        # original Y row (1, W)
            cur = out_ref[pl.ds(xl, 1), :]                        # keeps earlier injections
            out_ref[pl.ds(xl, 1), :] = jnp.where(cols == ys, y_row + amp, cur)

    if n_src <= 16:
        # Small, static source count: unroll (cheapest, LLO can schedule it).
        for s in range(n_src):
            _inject(s)
    else:
        # Large source count: keep code size bounded.
        def body(s, carry):
            _inject(s)
            return carry

        jax.lax.fori_loop(0, n_src, body, 0)


def _pick_row_tile(H, W, itemsize, budget_bytes=2 * 1024 * 1024):
    """Largest power-of-two multiple of 8 that divides H and keeps one block
    <= budget_bytes (so in+out double-buffering stays well inside scoped VMEM
    on every generation, including v7x's 64 MiB).  Falls back to the full dim
    (always a legal block) if H has no suitable divisor."""
    max_rows = max(8, budget_bytes // max(1, W * itemsize))
    best = None
    th = 8
    while th <= min(H, max_rows):
        if H % th == 0:
            best = th
        th *= 2
    return best if best is not None else H


def wave_source_forward(Y, X, x_loc, y_loc, dt=1.0, *, row_tile=None):
    """Pallas implementation of WaveSource.forward.

    Y:      [B, H, W] float32 wave field
    X:      [B, S]    float32 source amplitudes (one column per source point)
    x_loc:  [S]       int     source x indices (rows)
    y_loc:  [S]       int     source y indices (cols)
    """
    Y = jnp.asarray(Y)
    B, H, W = Y.shape
    X = jnp.asarray(X)
    S = int(X.shape[-1])
    assert X.shape == (B, S)

    xs = jnp.asarray(x_loc, dtype=jnp.int32).reshape(S)
    ys = jnp.asarray(y_loc, dtype=jnp.int32).reshape(S)
    # Fold dt**2 into the amplitudes host-side: removes the full-field multiply.
    amps = jnp.asarray(X, dtype=jnp.float32) * jnp.float32(float(dt) ** 2)

    if row_tile is None:
        row_tile = _pick_row_tile(H, W, jnp.dtype(Y.dtype).itemsize)
    assert H % row_tile == 0 and (row_tile % 8 == 0 or row_tile == H)

    grid = (B, H // row_tile)
    kernel = functools.partial(_wave_source_kernel, tile_h=row_tile, n_src=S)

    return pl.pallas_call(
        kernel,
        out_shape=jax.ShapeDtypeStruct(Y.shape, Y.dtype),
        grid=grid,
        in_specs=[
            pl.BlockSpec(memory_space=pltpu.MemorySpace.SMEM),   # xs  [S]
            pl.BlockSpec(memory_space=pltpu.MemorySpace.SMEM),   # ys  [S]
            pl.BlockSpec(memory_space=pltpu.MemorySpace.SMEM),   # dt^2 * X  [B, S]
            pl.BlockSpec((None, row_tile, W), lambda b, h: (b, h, 0)),  # Y slab
        ],
        out_specs=pl.BlockSpec((None, row_tile, W), lambda b, h: (b, h, 0)),
        compiler_params=pltpu.CompilerParams(
            dimension_semantics=("parallel", "parallel")),
    )(xs, ys, amps, Y)


def _reference_forward(Y, X, x_loc, y_loc, dt=1.0):
    """Pure-numpy reference mirroring the PyTorch module (last write wins)."""
    Yn = np.asarray(Y)
    Xn = np.asarray(X)
    x_expanded = np.zeros_like(Yn)
    for s in range(Xn.shape[1]):
        x_expanded[:, int(x_loc[s]), int(y_loc[s])] = Xn[:, s]
    return Yn + (dt ** 2) * x_expanded


if __name__ == "__main__":
    key = jax.random.PRNGKey(0)
    k1, k2 = jax.random.split(key)

    B, H, W, S = 2, 128, 256, 6
    Y = jax.random.normal(k1, (B, H, W), dtype=jnp.float32)
    X = jax.random.normal(k2, (B, S), dtype=jnp.float32)
    # Fixed source coordinates (the module's registered buffers).  Includes a
    # duplicated (x, y) pair (last-write-wins check) and leaves one row-tile
    # source-free to exercise the copy-only fast path.
    x_loc = np.array([3, 40, 40, 100, 101, 127], dtype=np.int32)
    y_loc = np.array([5, 200, 200, 13, 255, 0], dtype=np.int32)
    dt = 0.5

    ref = _reference_forward(np.asarray(Y), np.asarray(X), x_loc, y_loc, dt=dt)

    # Explicitly tiled run (grid = (2, 4)) and auto-tiled run.
    out_tiled = jax.block_until_ready(
        wave_source_forward(Y, X, x_loc, y_loc, dt=dt, row_tile=32))
    out_auto = jax.block_until_ready(
        wave_source_forward(Y, X, x_loc, y_loc, dt=dt))

    np.testing.assert_allclose(np.asarray(out_tiled), ref, rtol=1e-6, atol=1e-6)
    np.testing.assert_allclose(np.asarray(out_auto), ref, rtol=1e-6, atol=1e-6)

    print("KERNEL_OK")
</pallas_src>

<mosaic_0001>
module attributes {stable_mosaic.version = 11 : i64} {
  func.func @_wave_source_kernel(%arg0: i32, %arg1: i32, %arg2: memref<6xi32, #tpu.memory_space<smem>>, %arg3: memref<6xi32, #tpu.memory_space<smem>>, %arg4: memref<2x6xf32, #tpu.memory_space<smem>>, %arg5: memref<1x32x256xf32, #tpu.memory_space<vmem>>, %arg6: memref<1x32x256xf32, #tpu.memory_space<vmem>>) attributes {dimension_semantics = [#tpu.dimension_semantics<parallel>, #tpu.dimension_semantics<parallel>], iteration_bounds = array<i64: 2, 4>, scalar_prefetch = 0 : i64, scratch_operands = 0 : i64, tpu.core_type = #tpu.core_type<tc>, window_params = [{transform_indices = @transform_0, window_bounds = array<i64: 6>}, {transform_indices = @transform_1, window_bounds = array<i64: 6>}, {transform_indices = @transform_2, window_bounds = array<i64: 2, 6>}, {transform_indices = @transform_3, window_bounds = array<i64: 1, 32, 256>}, {transform_indices = @transform_4, window_bounds = array<i64: 1, 32, 256>}]} {
    %c32_i32 = arith.constant 32 : i32
    %0 = arith.muli %arg1, %c32_i32 : i32
    %c0 = arith.constant 0 : index
    %c0_0 = arith.constant 0 : index
    %c0_1 = arith.constant 0 : index
    %1 = vector.load %arg5[%c0, %c0_0, %c0_1] : memref<1x32x256xf32, #tpu.memory_space<vmem>>, vector<1x32x256xf32>
    %2 = vector.shape_cast %1 : vector<1x32x256xf32> to vector<32x256xf32>
    %c0_2 = arith.constant 0 : index
    %c0_3 = arith.constant 0 : index
    %c0_4 = arith.constant 0 : index
    %3 = vector.load %arg6[%c0_2, %c0_3, %c0_4] : memref<1x32x256xf32, #tpu.memory_space<vmem>>, vector<1x32x256xf32>
    %4 = vector.shape_cast %3 : vector<1x32x256xf32> to vector<32x256xf32>
    %5 = vector.shape_cast %2 : vector<32x256xf32> to vector<1x32x256xf32>
    tpu.vector_store %arg6[%c0_2, %c0_3, %c0_4], %5 {strides = array<i32>} : memref<1x32x256xf32, #tpu.memory_space<vmem>>, vector<1x32x256xf32>,
    %c0_5 = arith.constant 0 : index
    %6 = memref.load %arg2[%c0_5] : memref<6xi32, #tpu.memory_space<smem>>
    %c0_6 = arith.constant 0 : index
    %7 = memref.load %arg3[%c0_6] : memref<6xi32, #tpu.memory_space<smem>>
    %8 = arith.cmpi sge, %6, %0 : i32
    %c32_i32_7 = arith.constant 32 : i32
    %9 = arith.addi %0, %c32_i32_7 : i32
    %10 = arith.cmpi slt, %6, %9 : i32
    %11 = arith.andi %8, %10 : i1
    %12 = arith.extui %11 : i1 to i32
    %c0_i32 = arith.constant 0 : i32
    %13 = arith.cmpi ne, %12, %c0_i32 : i32
    scf.if %13 {
      %54 = arith.subi %6, %0 : i32
      %55 = tpu.iota {dimensions = array<i32: 1>} : vector<1x256xi32>
      %56 = arith.index_cast %arg0 : i32 to index
      %c0_23 = arith.constant 0 : index
      %57 = memref.load %arg4[%56, %c0_23] : memref<2x6xf32, #tpu.memory_space<smem>>
      %c0_24 = arith.constant 0 : index
      %58 = arith.index_cast %54 : i32 to index
      %c0_25 = arith.constant 0 : index
      %59 = vector.load %arg5[%c0_24, %58, %c0_25] : memref<1x32x256xf32, #tpu.memory_space<vmem>>, vector<1x1x256xf32>
      %60 = vector.shape_cast %59 : vector<1x1x256xf32> to vector<1x256xf32>
      %c0_26 = arith.constant 0 : index
      %61 = arith.index_cast %54 : i32 to index
      %c0_27 = arith.constant 0 : index
      %62 = vector.load %arg6[%c0_26, %61, %c0_27] : memref<1x32x256xf32, #tpu.memory_space<vmem>>, vector<1x1x256xf32>
      %63 = vector.shape_cast %62 : vector<1x1x256xf32> to vector<1x256xf32>
      %64 = vector.broadcast %7 : i32 to vector<1x256xi32>
      %65 = arith.cmpi eq, %55, %64 : vector<1x256xi32>
      %66 = vector.broadcast %57 : f32 to vector<1x256xf32>
      %67 = arith.addf %60, %66 : vector<1x256xf32>
      %68 = arith.select %65, %67, %63 : vector<1x256xi1>, vector<1x256xf32>
      %c0_28 = arith.constant 0 : index
      %69 = arith.index_cast %54 : i32 to index
      %c0_29 = arith.constant 0 : index
      %70 = vector.load %arg6[%c0_28, %69, %c0_29] : memref<1x32x256xf32, #tpu.memory_space<vmem>>, vector<1x1x256xf32>
      %71 = vector.shape_cast %70 : vector<1x1x256xf32> to vector<1x256xf32>
      %72 = vector.shape_cast %68 : vector<1x256xf32> to vector<1x1x256xf32>
      tpu.vector_store %arg6[%c0_28, %69, %c0_29], %72 {strides = array<i32>} : memref<1x32x256xf32, #tpu.memory_space<vmem>>, vector<1x1x256xf32>,
    } else {
    }
    %c1 = arith.constant 1 : index
    %14 = memref.load %arg2[%c1] : memref<6xi32, #tpu.memory_space<smem>>
    %c1_8 = arith.constant 1 : index
    %15 = memref.load %arg3[%c1_8] : memref<6xi32, #tpu.memory_space<smem>>
    %16 = arith.cmpi sge, %14, %0 : i32
    %c32_i32_9 = arith.constant 32 : i32
    %17 = arith.addi %0, %c32_i32_9 : i32
    %18 = arith.cmpi slt, %14, %17 : i32
    %19 = arith.andi %16, %18 : i1
    %20 = arith.extui %19 : i1 to i32
    %c0_i32_10 = arith.constant 0 : i32
    %21 = arith.cmpi ne, %20, %c0_i32_10 : i32
    scf.if %21 {
      %54 = arith.subi %14, %0 : i32
      %55 = tpu.iota {dimensions = array<i32: 1>} : vector<1x256xi32>
      %56 = arith.index_cast %arg0 : i32 to index
      %c1_23 = arith.constant 1 : index
      %57 = memref.load %arg4[%56, %c1_23] : memref<2x6xf32, #tpu.memory_space<smem>>
      %c0_24 = arith.constant 0 : index
      %58 = arith.index_cast %54 : i32 to index
      %c0_25 = arith.constant 0 : index
      %59 = vector.load %arg5[%c0_24, %58, %c0_25] : memref<1x32x256xf32, #tpu.memory_space<vmem>>, vector<1x1x256xf32>
      %60 = vector.shape_cast %59 : vector<1x1x256xf32> to vector<1x256xf32>
      %c0_26 = arith.constant 0 : index
      %61 = arith.index_cast %54 : i32 to index
      %c0_27 = arith.constant 0 : index
      %62 = vector.load %arg6[%c0_26, %61, %c0_27] : memref<1x32x256xf32, #tpu.memory_space<vmem>>, vector<1x1x256xf32>
      %63 = vector.shape_cast %62 : vector<1x1x256xf32> to vector<1x256xf32>
      %64 = vector.broadcast %15 : i32 to vector<1x256xi32>
      %65 = arith.cmpi eq, %55, %64 : vector<1x256xi32>
      %66 = vector.broadcast %57 : f32 to vector<1x256xf32>
      %67 = arith.addf %60, %66 : vector<1x256xf32>
      %68 = arith.select %65, %67, %63 : vector<1x256xi1>, vector<1x256xf32>
      %c0_28 = arith.constant 0 : index
      %69 = arith.index_cast %54 : i32 to index
      %c0_29 = arith.constant 0 : index
      %70 = vector.load %arg6[%c0_28, %69, %c0_29] : memref<1x32x256xf32, #tpu.memory_space<vmem>>, vector<1x1x256xf32>
      %71 = vector.shape_cast %70 : vector<1x1x256xf32> to vector<1x256xf32>
      %72 = vector.shape_cast %68 : vector<1x256xf32> to vector<1x1x256xf32>
      tpu.vector_store %arg6[%c0_28, %69, %c0_29], %72 {strides = array<i32>} : memref<1x32x256xf32, #tpu.memory_space<vmem>>, vector<1x1x256xf32>,
    } else {
    }
    %c2 = arith.constant 2 : index
    %22 = memref.load %arg2[%c2] : memref<6xi32, #tpu.memory_space<smem>>
    %c2_11 = arith.constant 2 : index
    %23 = memref.load %arg3[%c2_11] : memref<6xi32, #tpu.memory_space<smem>>
    %24 = arith.cmpi sge, %22, %0 : i32
    %c32_i32_12 = arith.constant 32 : i32
    %25 = arith.addi %0, %c32_i32_12 : i32
    %26 = arith.cmpi slt, %22, %25 : i32
    %27 = arith.andi %24, %26 : i1
    %28 = arith.extui %27 : i1 to i32
    %c0_i32_13 = arith.constant 0 : i32
    %29 = arith.cmpi ne, %28, %c0_i32_13 : i32
    scf.if %29 {
      %54 = arith.subi %22, %0 : i32
      %55 = tpu.iota {dimensions = array<i32: 1>} : vector<1x256xi32>
      %56 = arith.index_cast %arg0 : i32 to index
      %c2_23 = arith.constant 2 : index
      %57 = memref.load %arg4[%56, %c2_23] : memref<2x6xf32, #tpu.memory_space<smem>>
      %c0_24 = arith.constant 0 : index
      %58 = arith.index_cast %54 : i32 to index
      %c0_25 = arith.constant 0 : index
      %59 = vector.load %arg5[%c0_24, %58, %c0_25] : memref<1x32x256xf32, #tpu.memory_space<vmem>>, vector<1x1x256xf32>
      %60 = vector.shape_cast %59 : vector<1x1x256xf32> to vector<1x256xf32>
      %c0_26 = arith.constant 0 : index
      %61 = arith.index_cast %54 : i32 to index
      %c0_27 = arith.constant 0 : index
      %62 = vector.load %arg6[%c0_26, %61, %c0_27] : memref<1x32x256xf32, #tpu.memory_space<vmem>>, vector<1x1x256xf32>
      %63 = vector.shape_cast %62 : vector<1x1x256xf32> to vector<1x256xf32>
      %64 = vector.broadcast %23 : i32 to vector<1x256xi32>
      %65 = arith.cmpi eq, %55, %64 : vector<1x256xi32>
      %66 = vector.broadcast %57 : f32 to vector<1x256xf32>
      %67 = arith.addf %60, %66 : vector<1x256xf32>
      %68 = arith.select %65, %67, %63 : vector<1x256xi1>, vector<1x256xf32>
      %c0_28 = arith.constant 0 : index
      %69 = arith.index_cast %54 : i32 to index
      %c0_29 = arith.constant 0 : index
      %70 = vector.load %arg6[%c0_28, %69, %c0_29] : memref<1x32x256xf32, #tpu.memory_space<vmem>>, vector<1x1x256xf32>
      %71 = vector.shape_cast %70 : vector<1x1x256xf32> to vector<1x256xf32>
      %72 = vector.shape_cast %68 : vector<1x256xf32> to vector<1x1x256xf32>
      tpu.vector_store %arg6[%c0_28, %69, %c0_29], %72 {strides = array<i32>} : memref<1x32x256xf32, #tpu.memory_space<vmem>>, vector<1x1x256xf32>,
    } else {
    }
    %c3 = arith.constant 3 : index
    %30 = memref.load %arg2[%c3] : memref<6xi32, #tpu.memory_space<smem>>
    %c3_14 = arith.constant 3 : index
    %31 = memref.load %arg3[%c3_14] : memref<6xi32, #tpu.memory_space<smem>>
    %32 = arith.cmpi sge, %30, %0 : i32
    %c32_i32_15 = arith.constant 32 : i32
    %33 = arith.addi %0, %c32_i32_15 : i32
    %34 = arith.cmpi slt, %30, %33 : i32
    %35 = arith.andi %32, %34 : i1
    %36 = arith.extui %35 : i1 to i32
    %c0_i32_16 = arith.constant 0 : i32
    %37 = arith.cmpi ne, %36, %c0_i32_16 : i32
    scf.if %37 {
      %54 = arith.subi %30, %0 : i32
      %55 = tpu.iota {dimensions = array<i32: 1>} : vector<1x256xi32>
      %56 = arith.index_cast %arg0 : i32 to index
      %c3_23 = arith.constant 3 : index
      %57 = memref.load %arg4[%56, %c3_23] : memref<2x6xf32, #tpu.memory_space<smem>>
      %c0_24 = arith.constant 0 : index
      %58 = arith.index_cast %54 : i32 to index
      %c0_25 = arith.constant 0 : index
      %59 = vector.load %arg5[%c0_24, %58, %c0_25] : memref<1x32x256xf32, #tpu.memory_space<vmem>>, vector<1x1x256xf32>
      %60 = vector.shape_cast %59 : vector<1x1x256xf32> to vector<1x256xf32>
      %c0_26 = arith.constant 0 : index
      %61 = arith.index_cast %54 : i32 to index
      %c0_27 = arith.constant 0 : index
      %62 = vector.load %arg6[%c0_26, %61, %c0_27] : memref<1x32x256xf32, #tpu.memory_space<vmem>>, vector<1x1x256xf32>
      %63 = vector.shape_cast %62 : vector<1x1x256xf32> to vector<1x256xf32>
      %64 = vector.broadcast %31 : i32 to vector<1x256xi32>
      %65 = arith.cmpi eq, %55, %64 : vector<1x256xi32>
      %66 = vector.broadcast %57 : f32 to vector<1x256xf32>
      %67 = arith.addf %60, %66 : vector<1x256xf32>
      %68 = arith.select %65, %67, %63 : vector<1x256xi1>, vector<1x256xf32>
      %c0_28 = arith.constant 0 : index
      %69 = arith.index_cast %54 : i32 to index
      %c0_29 = arith.constant 0 : index
      %70 = vector.load %arg6[%c0_28, %69, %c0_29] : memref<1x32x256xf32, #tpu.memory_space<vmem>>, vector<1x1x256xf32>
      %71 = vector.shape_cast %70 : vector<1x1x256xf32> to vector<1x256xf32>
      %72 = vector.shape_cast %68 : vector<1x256xf32> to vector<1x1x256xf32>
      tpu.vector_store %arg6[%c0_28, %69, %c0_29], %72 {strides = array<i32>} : memref<1x32x256xf32, #tpu.memory_space<vmem>>, vector<1x1x256xf32>,
    } else {
    }
    %c4 = arith.constant 4 : index
    %38 = memref.load %arg2[%c4] : memref<6xi32, #tpu.memory_space<smem>>
    %c4_17 = arith.constant 4 : index
    %39 = memref.load %arg3[%c4_17] : memref<6xi32, #tpu.memory_space<smem>>
    %40 = arith.cmpi sge, %38, %0 : i32
    %c32_i32_18 = arith.constant 32 : i32
    %41 = arith.addi %0, %c32_i32_18 : i32
    %42 = arith.cmpi slt, %38, %41 : i32
    %43 = arith.andi %40, %42 : i1
    %44 = arith.extui %43 : i1 to i32
    %c0_i32_19 = arith.constant 0 : i32
    %45 = arith.cmpi ne, %44, %c0_i32_19 : i32
    scf.if %45 {
      %54 = arith.subi %38, %0 : i32
      %55 = tpu.iota {dimensions = array<i32: 1>} : vector<1x256xi32>
      %56 = arith.index_cast %arg0 : i32 to index
      %c4_23 = arith.constant 4 : index
      %57 = memref.load %arg4[%56, %c4_23] : memref<2x6xf32, #tpu.memory_space<smem>>
      %c0_24 = arith.constant 0 : index
      %58 = arith.index_cast %54 : i32 to index
      %c0_25 = arith.constant 0 : index
      %59 = vector.load %arg5[%c0_24, %58, %c0_25] : memref<1x32x256xf32, #tpu.memory_space<vmem>>, vector<1x1x256xf32>
      %60 = vector.shape_cast %59 : vector<1x1x256xf32> to vector<1x256xf32>
      %c0_26 = arith.constant 0 : index
      %61 = arith.index_cast %54 : i32 to index
      %c0_27 = arith.constant 0 : index
      %62 = vector.load %arg6[%c0_26, %61, %c0_27] : memref<1x32x256xf32, #tpu.memory_space<vmem>>, vector<1x1x256xf32>
      %63 = vector.shape_cast %62 : vector<1x1x256xf32> to vector<1x256xf32>
      %64 = vector.broadcast %39 : i32 to vector<1x256xi32>
      %65 = arith.cmpi eq, %55, %64 : vector<1x256xi32>
      %66 = vector.broadcast %57 : f32 to vector<1x256xf32>
      %67 = arith.addf %60, %66 : vector<1x256xf32>
      %68 = arith.select %65, %67, %63 : vector<1x256xi1>, vector<1x256xf32>
      %c0_28 = arith.constant 0 : index
      %69 = arith.index_cast %54 : i32 to index
      %c0_29 = arith.constant 0 : index
      %70 = vector.load %arg6[%c0_28, %69, %c0_29] : memref<1x32x256xf32, #tpu.memory_space<vmem>>, vector<1x1x256xf32>
      %71 = vector.shape_cast %70 : vector<1x1x256xf32> to vector<1x256xf32>
      %72 = vector.shape_cast %68 : vector<1x256xf32> to vector<1x1x256xf32>
      tpu.vector_store %arg6[%c0_28, %69, %c0_29], %72 {strides = array<i32>} : memref<1x32x256xf32, #tpu.memory_space<vmem>>, vector<1x1x256xf32>,
    } else {
    }
    %c5 = arith.constant 5 : index
    %46 = memref.load %arg2[%c5] : memref<6xi32, #tpu.memory_space<smem>>
    %c5_20 = arith.constant 5 : index
    %47 = memref.load %arg3[%c5_20] : memref<6xi32, #tpu.memory_space<smem>>
    %48 = arith.cmpi sge, %46, %0 : i32
    %c32_i32_21 = arith.constant 32 : i32
    %49 = arith.addi %0, %c32_i32_21 : i32
    %50 = arith.cmpi slt, %46, %49 : i32
    %51 = arith.andi %48, %50 : i1
    %52 = arith.extui %51 : i1 to i32
    %c0_i32_22 = arith.constant 0 : i32
    %53 = arith.cmpi ne, %52, %c0_i32_22 : i32
    scf.if %53 {
      %54 = arith.subi %46, %0 : i32
      %55 = tpu.iota {dimensions = array<i32: 1>} : vector<1x256xi32>
      %56 = arith.index_cast %arg0 : i32 to index
      %c5_23 = arith.constant 5 : index
      %57 = memref.load %arg4[%56, %c5_23] : memref<2x6xf32, #tpu.memory_space<smem>>
      %c0_24 = arith.constant 0 : index
      %58 = arith.index_cast %54 : i32 to index
      %c0_25 = arith.constant 0 : index
      %59 = vector.load %arg5[%c0_24, %58, %c0_25] : memref<1x32x256xf32, #tpu.memory_space<vmem>>, vector<1x1x256xf32>
      %60 = vector.shape_cast %59 : vector<1x1x256xf32> to vector<1x256xf32>
      %c0_26 = arith.constant 0 : index
      %61 = arith.index_cast %54 : i32 to index
      %c0_27 = arith.constant 0 : index
      %62 = vector.load %arg6[%c0_26, %61, %c0_27] : memref<1x32x256xf32, #tpu.memory_space<vmem>>, vector<1x1x256xf32>
      %63 = vector.shape_cast %62 : vector<1x1x256xf32> to vector<1x256xf32>
      %64 = vector.broadcast %47 : i32 to vector<1x256xi32>
      %65 = arith.cmpi eq, %55, %64 : vector<1x256xi32>
      %66 = vector.broadcast %57 : f32 to vector<1x256xf32>
      %67 = arith.addf %60, %66 : vector<1x256xf32>
      %68 = arith.select %65, %67, %63 : vector<1x256xi1>, vector<1x256xf32>
      %c0_28 = arith.constant 0 : index
      %69 = arith.index_cast %54 : i32 to index
      %c0_29 = arith.constant 0 : index
      %70 = vector.load %arg6[%c0_28, %69, %c0_29] : memref<1x32x256xf32, #tpu.memory_space<vmem>>, vector<1x1x256xf32>
      %71 = vector.shape_cast %70 : vector<1x1x256xf32> to vector<1x256xf32>
      %72 = vector.shape_cast %68 : vector<1x256xf32> to vector<1x1x256xf32>
      tpu.vector_store %arg6[%c0_28, %69, %c0_29], %72 {strides = array<i32>} : memref<1x32x256xf32, #tpu.memory_space<vmem>>, vector<1x1x256xf32>,
    } else {
    }
    return
  }
  func.func @transform_0(%arg0: i32, %arg1: i32) -> i32 {
    %c0_i32 = arith.constant 0 : i32
    %c0_i32_0 = arith.constant 0 : i32
    return %c0_i32 : i32
  }
  func.func @transform_1(%arg0: i32, %arg1: i32) -> i32 {
    %c0_i32 = arith.constant 0 : i32
    %c0_i32_0 = arith.constant 0 : i32
    return %c0_i32 : i32
  }
  func.func @transform_2(%arg0: i32, %arg1: i32) -> (i32, i32) {
    %c0_i32 = arith.constant 0 : i32
    %c0_i32_0 = arith.constant 0 : i32
    %c0_i32_1 = arith.constant 0 : i32
    return %c0_i32, %c0_i32_0 : i32, i32
  }
  func.func @transform_3(%arg0: i32, %arg1: i32) -> (i32, i32, i32) {
    %c0_i32 = arith.constant 0 : i32
    %c0_i32_0 = arith.constant 0 : i32
    return %arg0, %arg1, %c0_i32 : i32, i32, i32
  }
  func.func @transform_4(%arg0: i32, %arg1: i32) -> (i32, i32, i32) {
    %c0_i32 = arith.constant 0 : i32
    %c0_i32_0 = arith.constant 0 : i32
    return %arg0, %arg1, %c0_i32 : i32, i32, i32
  }
}

</mosaic_0001>

<bundles_post_ra>
// kernel: tpu_custom_call.1
= control target key start
LH: loop header
LB: loop body
LE: loop exit
PB: predicated region body
PF: predicated region fallthrough
CT: control target
= control target key end

     0   :  { %s1647_s0 = inlined_call_operand.hbm [shape: s32[6], index: 0, kind: input, shape index: {}]   ;;  %s1648_s1 = inlined_call_operand.vmem [shape: s32[6], index: 1, kind: input, shape index: {}]   ;;  %s1649_s2 = inlined_call_operand.vmem [shape: f32[2,6], index: 2, kind: input, shape index: {}]   ;;  %s1650_s3 = inlined_call_operand.hbm [shape: f32[2,128,256], index: 3, kind: input, shape index: {}]   ;;  %s1651_s4 = inlined_call_operand.hbm [shape: f32[2,128,256], index: 4, kind: output, shape index: {}]  }
   0x1   :  { %1659 = sst [smem:[#allocation20_spill]] %s1647_s0 }
   0x2   :  { %1660 = sst [smem:[#allocation21_spill]] %s1648_s1 }
   0x3   :  { %1661 = sst [smem:[#allocation22_spill]] %s1649_s2 }
   0x4   :  { %9 = vsyncpa [#allocation5], 0 }
   0x5   :  { %10 = vsyncpa [#allocation6], 0 }
   0x6   :  { %11 = vsyncpa [#allocation9], 0 }
   0x7   :  { %12 = vsyncpa [#allocation3], 0 }
   0x8   :  { %14 = vsyncpa [#allocation3 + $0x1], 0 }
   0x9   :  { %15 = vsyncpa [#allocation4], 0 }
   0xa   :  { %17 = vsyncpa [#allocation4 + $0x1], 0  ;;  %s1343_s15 = smov 0   ;;  %s1345_s16 = smov 0  }
   0xb   :  { %s1347_s17 = smov 0   ;;  %s1349_s18 = smov 0  }
   0xc   :  { %s1351_s19 = smov 0   ;;  %s1353_s20 = smov 0  }
   0xd   :  { %s1355_s21 = smov 0   ;;  %s1357_s22 = smov 0  }
   0xe LB: > { %1662 = sst [smem:[#allocation17_spill]] %s1293_s20  ;;  %s943_s23 = sadd.s32 4294967295, %s1301_s22   ;;  %s1301_s22 = sphi %s1357_s22, %s23_s22   ;;  %s1297_s21 = sphi %s1355_s21, %s1689_s21   ;;  %s1293_s20 = sphi %s1353_s20, %s1684_s20   ;;  %s1289_s19 = sphi %s1351_s19, %s1688_s19   ;;  %s1285_s18 = sphi %s1349_s18, %s1683_s18   ;;  %s1281_s17 = sphi %s1347_s17, %s1687_s17   ;;  %s1277_s16 = sphi %s1345_s16, %s1686_s16   ;;  %s1273_s15 = sphi %s1343_s15, %s1685_s15  }
   0xf   : > { %s944_s24 = sadd.s32 4294967294, %s1301_s22   ;;  %p120_p0 = scmp.ne.s32.totalorder %s1277_s16, %s1273_s15 }
  0x10   : > { %p1387_p1 = scmp.eq.s32.totalorder %s943_s23, 0  ;;  %p1391_p2 = scmp.eq.s32.totalorder %s943_s23, 7 }
  0x11   : > { %p152_p3 = scmp.eq.s32.totalorder %s944_s24, 7  ;;  %p945_p5 = scmp.ge.s32.totalorder %s1301_s22, 1 }
  0x12   : > { %s1663_s25 = scalar_select %p1387_p1, 1, 0 }
  0x13   : > { %s1664_s26 = scalar_select %p1391_p2, 1, 0 }
  0x14   : > { %p1397_p4 = por %p1387_p1, %p120_p0  ;;  %p1402_p6 = por %p152_p3, %p120_p0 }
  0x15   : > { %p159_p7 = scmp.lt.s32.totalorder %s1301_s22, 9  ;;  %s1669_s1 = sld [smem:[#allocation21_spill]] }
  0x16   : > { %s1665_s27 = scalar_select %p1397_p4, 1, 0 }
  0x17   : > { %s1666_s28 = scalar_select %p1402_p6, 1, 0 }
  0x18   : > { %p1407_p8 = pnand %p945_p5, %p159_p7  ;;  %s1670_s2 = sld [smem:[#allocation22_spill]] }
  0x19   : > { %1667 = sst [smem:[#allocation18_spill]] %s1666_s28  ;;  %s1303_s11 = smov [#allocation2]  }
  0x1a   : > { %s1668_s29 = scalar_select %p1407_p8, 1, 0 }
  0x1b   : > { %s181_s6 = sshll.u32 %s1669_s1, 4  ;;  %p1021_p9 = pneg %p1407_p8  ;;  %s182_s6 = int_to_ptr.vmem [resolvable:$true] %s181_s6 }
  0x1c   : > { %s1672_s0 = sld [smem:[#allocation20_spill]]  ;;  %s1135_s14 = scalar_lea.vmem %s182_s6, 16 }
  0x1d   : > { %p1421_p10 = pnand %p1021_p9, %p1387_p1  ;;  %p1136_p11 = scmp.ne.s32.totalorder %s182_s6, %s1135_s14 }
  0x1e   : > { %s192_s9 = sshll.u32 %s1670_s2, 4  ;;  %p1143_p3 = scmp.lt.s32.totalorder %s182_s6, %s182_s6  ;;  %s193_s9 = int_to_ptr.vmem [resolvable:$true] %s192_s9 }
  0x1f   : > { %p1137_p12 = pneg %p1421_p10  ;;  %p1144_p5 = scmp.lt.s32.totalorder %s1135_s14, %s1135_s14 }
  0x21   : > { %p1138_p13 = pnand %p1137_p12, %p1136_p11  ;;  %p1145_p7 = por %p1144_p5, %p1143_p3 }
  0x22   : > { %1024 = dma.hbm_to_smem (!%p1421_p10), %s1672_s0, 16, %s1303_s11, [#allocation5]  }
  0x23   : > { %p1139_p0 = pneg %p1138_p13 }
  0x25   : > { %p1146_p9 = pnand %p1145_p7, %p1139_p0 }
  0x27   : > { %1149 = shalt.err (!%p1146_p9)
}
  0x28   : > { %s1304_s23 = smov [#allocation7]   ;;  %s1150_s24 = scalar_lea.vmem %s193_s9, 32 }
  0x29   : > { %1027 = dma.vmem_to_smem (!%p1421_p10), %s182_s6, 16, %s1304_s23, [#allocation6]  }
  0x2a   : > { %p1151_p6 = scmp.ne.s32.totalorder %s193_s9, %s1150_s24  ;;  %p1158_p8 = scmp.lt.s32.totalorder %s193_s9, %s193_s9 }
  0x2b   : > { %p1159_p2 = scmp.lt.s32.totalorder %s1150_s24, %s1150_s24 }
  0x2c   : > { %p1153_p4 = pnand %p1151_p6, %p1137_p12 }
  0x2d   : > { %p1160_p11 = por %p1159_p2, %p1158_p8 }
  0x2e   : > { %p1154_p1 = pneg %p1153_p4 }
  0x30   : > { %p1161_p13 = pnand %p1160_p11, %p1154_p1 }
  0x32   : > { %1164 = shalt.err (!%p1161_p13)
}
  0x33   : > { %s1305_s30 = smov [#allocation8]   ;;  %s32_s5 = sadd.s32 1, %s1293_s20 }
  0x34   : > { %1030 = dma.vmem_to_smem (!%p1421_p10), %s193_s9, 32, %s1305_s30, [#allocation9]  }
  0x35   : > { %p33_p1 = scmp.ge.s32.totalorder %s32_s5, 4  ;;  %s35_s6 = sadd.s32 1, %s1297_s21 }
  0x36   : > { %s107_s7 = sadd.s32 1, %s1281_s17  ;;  %p114_p2 = scmp.ne.s32.totalorder %s1281_s17, %s1277_s16 }
  0x37   : > { %s1691_s5 = smov (%p33_p1, %s32_s5), 0  ;;  %s1693_s6 = smov (!%p33_p1, %s35_s6), %s1297_s21 }
  0x38   : > { %1673 = sst [smem:[#allocation19_spill]] %s1691_s5  ;;  %s103_s8 = ssub.s32 %s1293_s20, %s1691_s5 }
  0x39   : > { %p115_p4 = scmp.eq.s32.totalorder %s1301_s22, 0  ;;  %p37_p6 = scmp.ge.s32.totalorder %s1693_s6, 2 }
  0x3a   : > { %p1674_p8 = scmp.ne.s32.totalorder %s1664_s26, 0  ;;  %p1042_p0 = scmp.lt.s32.totalorder %s1301_s22, 8 }
  0x3b   : > { %p1453_p10 = por %p115_p4, %p114_p2  ;;  %s1695_s6 = smov (%p37_p6, %s1693_s6), 0 }
  0x3c   : > { %p1449_p12 = por %p1674_p8, %p114_p2  ;;  %s203_s11 = sand.u32 1, %s1281_s17  }
  0x3d   : > { %s997_s12 = sshll.u32 %s1293_s20, 3  ;;  %s102_s13 = ssub.s32 %s1297_s21, %s1695_s6 }
  0x3e   : > { %s104_s14 = sor.u32 %s103_s8, %s102_s13  ;;  %s950_s23 = sshll.u32 %s203_s11, 6 }
  0x3f   : > { %p105_p3 = scmp.eq.s32.totalorder %s104_s14, 0  ;;  %s953_s26 = sshll.u32 %s1297_s21, 5 }
  0x40   : > { %s207_s24 = scalar_lea.vmem [#allocation10], %s950_s23  ;;  %s214_s1 = sadd.s32 %s997_s12, %s953_s26 }
  0x41   : > { %s217_s30 = sshll.u32 %s207_s24, 4  ;;  %s954_s2 = sshll.u32 %s214_s1, 7  ;;  %s218_s30 = int_to_ptr.vmem [resolvable:$true] %s217_s30 }
  0x42   : > { %s1466_s0 = scalar_select %p105_p3, %s1281_s17, %s107_s7  }
  0x43   : > { %p1472_p5 = pnand %p1042_p0, %p1453_p10  ;;  %s216_s8 = scalar_lea.hbm %s1650_s3, %s954_s2 }
  0x44   : > { %s204_s13 = scalar_lea.sflag [#allocation3], %s203_s11  ;;  %s1178_s14 = scalar_lea.vmem %s218_s30, 1024 }
  0x45   : > { %p1167_p7 = pneg %p1472_p5  ;;  %p1179_p9 = scmp.ne.s32.totalorder %s218_s30, %s1178_s14 }
  0x46   : > { %s1306_s7 = smov [#allocation10]  }
  0x47   : > { %p1181_p11 = pnand %p1179_p9, %p1167_p7  ;;  %s1183_s1 = sshll.u32 %s1306_s7, 4  ;;  %s1184_s1 = int_to_ptr.vmem [resolvable:$false] %s1183_s1 }
  0x48   : > { %s1185_s9 = scalar_lea.vmem %s1184_s1, 2048  ;;  %p1186_p1 = scmp.lt.s32.totalorder %s218_s30, %s1184_s1 }
  0x49   : > { %p1182_p13 = pneg %p1181_p11  ;;  %p1187_p2 = scmp.lt.s32.totalorder %s1185_s9, %s1178_s14 }
  0x4b   : > { %p1188_p4 = por %p1187_p2, %p1186_p1 }
  0x4d   : > { %p1189_p6 = pnand %p1188_p4, %p1182_p13 }
  0x4f   : > { %1192 = shalt.err (!%p1189_p6)
}
  0x50   : > { %s1307_s12 = smov 256   ;;  %s1308_s20 = smov 16  }
  0x51   : > { %1034 = dma.hbm_to_vmem [thread:$0]  (!%p1472_p5), %s216_s8, 1024, %s218_s30, %s204_s13, %s1307_s12, %s1307_s12, %s1308_s20  }
  0x52   : > { %p1678_p8 = scmp.ne.s32.totalorder %s1668_s29, 0 }
  0x53   : > { %p1679_p10 = scmp.ne.s32.totalorder (!%p1678_p8), %s1663_s25, 0 }
  0x54   : > { %229 = sbr.rel (%p1678_p8) target bundleno = 319 (0x13f), region = 36 }
  0x59   : > { %1252 = dma.done.wait (%p1679_p10), [#allocation5], 16  }
  0x5a   : > { %1254 = vsyncadd (%p1679_p10), [#allocation5], 4294967280 }
  0x5b   : > { %1256 = dma.done.wait (%p1679_p10), [#allocation6], 16  }
  0x5c   : > { %1258 = vsyncadd (%p1679_p10), [#allocation6], 4294967280 }
  0x5d   : > { %1260 = dma.done.wait (%p1679_p10), [#allocation9], 32  }
  0x5e   : > { %1262 = vsyncadd (%p1679_p10), [#allocation9], 4294967264  ;;  %s1498_s2 = sand.u32 1, %s1277_s16   ;;  %p1680_p0 = scmp.ne.s32.totalorder %s1665_s27, 0 }
  0x5f   : > { %s959_s28 = sshll.u32 %s1498_s2, 6  ;;  %s244_s29 = scalar_lea.sflag [#allocation3], %s1498_s2 }
  0x60   : > { %s1502_s5 = scalar_lea.vmem [#allocation10], %s959_s28 }
  0x61   : > { %1264 = dma.done.wait (%p1680_p0), %s244_s29, 1024  }
  0x62   : > { %1266 = vsyncadd (%p1680_p0), %s244_s29, 4294966272 }
  0x63   : > { %252 = sfence }
  0x64   : > { %v276_v0 = vld [vmem:[%s1502_s5] sm:$0xff]  ;;  %v277_v1 = vld [vmem:[%s1502_s5 + $0x8] sm:$0xff]  ;;  %v278_v2 = vld [vmem:[%s1502_s5 + $0x10] sm:$0xff]  ;;  %s1512_s25 = sshll.u32 %s1285_s18, 5  ;;  %s1514_s11 = scalar_lea.vmem [#allocation11], %s959_s28 }
  0x65   : > { %284 = vst [vmem:[%s1514_s11] sm:$0xff] %v276_v0  ;;  %285 = vst [vmem:[%s1514_s11 + $0x8] sm:$0xff] %v277_v1  ;;  %v279_v3 = vld [vmem:[%s1502_s5 + $0x18] sm:$0xff]  ;;  %v280_v4 = vld [vmem:[%s1502_s5 + $0x20] sm:$0xff]  ;;  %s292_s27 = sld [smem:[#allocation2]]  ;;  %s1532_s26 = sadd.s32 32, %s1512_s25 }
  0x66   : > { %286 = vst [vmem:[%s1514_s11 + $0x10] sm:$0xff] %v278_v2  ;;  %v281_v5 = vld [vmem:[%s1502_s5 + $0x28] sm:$0xff]  ;;  %287 = vst [vmem:[%s1514_s11 + $0x18] sm:$0xff] %v279_v3  ;;  %v282_v6 = vld [vmem:[%s1502_s5 + $0x30] sm:$0xff]  ;;  %s1527_s23 = sld [smem:[#allocation7]] }
  0x67   : > { %288 = vst [vmem:[%s1514_s11 + $0x20] sm:$0xff] %v280_v4  ;;  %289 = vst [vmem:[%s1514_s11 + $0x28] sm:$0xff] %v281_v5  ;;  %v283_v7 = vld [vmem:[%s1502_s5 + $0x38] sm:$0xff] }
  0x68   : > { %290 = vst [vmem:[%s1514_s11 + $0x30] sm:$0xff] %v282_v6  ;;  %291 = vst [vmem:[%s1514_s11 + $0x38] sm:$0xff] %v283_v7 }
  0x6b   : > { %p294_p3 = scmp.ge.s32.totalorder %s292_s27, %s1512_s25  ;;  %p296_p5 = scmp.lt.s32.totalorder %s292_s27, %s1532_s26 }
  0x6d   : > { %p297_p7 = pnand %p296_p5, %p294_p3 }
  0x6e   : > { %s301_s24 = ssub.s32 (!%p297_p7), %s292_s27, %s1512_s25  ;;  %s962_s30 = sshll.u32 (!%p297_p7), %s1289_s19, 7 }
  0x6f   : > { %300 = sbr.rel (%p297_p7) target bundleno = 133 (0x85), region = 56  ;;  %s306_s8 = sld [smem:[#allocation8 + %s962_s30]] (!%p297_p7) }
  0x70   : > { %s307_s13 = sshra.s32 (!%p297_p7), %s301_s24, 3  ;;  %s310_s14 = sand.u32 (!%p297_p7), 7, %s301_s24 }
  0x71   : > { %s998_s7 = sshll.u32 (!%p297_p7), %s307_s13, 4 }
  0x72   : > { %s313_s1 = sadd.s32 (!%p297_p7), %s998_s7, %s310_s14 }
  0x73   : > { %s314_s9 = scalar_lea.vmem (!%p297_p7), %s1502_s5, %s313_s1 [#allocation10]  ;;  %s316_s12 = scalar_lea.vmem (!%p297_p7), %s1514_s11, %s313_s1 [#allocation11] }
  0x74   : > { %v302_v8 = vlaneseq  ;;  %v1309_v11 = vmov 1966171168   ;;  %v315_v16 = vld [vmem:[%s314_s9] ss:$8 sm:$0x3]  ;;  %v318_v18 = vstv %s1527_s23 }
  0x75   : > { %v351_v12 = vunpack.c.l.s4 %v1309_v11  ;;  %v317_v17 = vld [vmem:[%s316_s12] ss:$8 sm:$0x3]  ;;  %v321_v19 = vstv %s306_s8 }
  0x76   : > { %v303_v9 = vand.u32 127, %v302_v8  ;;  %v325_v10 = vshrl.u32 %v302_v8, 7  ;;  %v322_v21 = vadd.f32 %v321_v19, %v315_v16  ;;  %vm367_vm2 = vcmp.lt.s32.totalorder %v302_v8, 256 }
  0x77   : > { %v352_v20 = vunpack.c.0.s8 %v351_v12 }
  0x78   : > { %v304_v13 = vadd.s32 128, %v303_v9  ;;  %v326_v14 = vsub.s32 0, %v325_v10  ;;  %v330_v15 = vsub.s32 1, %v325_v10  ;;  %vm319_vm0 = vcmp.eq.s32.totalorder %v303_v9, %v318_v18 }
  0x79   : > { %v355_v26 = vsub.s32 %v352_v20, %v325_v10 }
  0x7a   : > { %v338_v22 = vrot.slane %v317_v17, %v326_v14  ;;  %v342_v23 = vrot.slane %v317_v17, %v330_v15  ;;  %vm320_vm1 = vcmp.eq.s32.totalorder %v304_v13, %v318_v18  ;;  %v327_v24 = vrot.slane %v322_v21, %v326_v14 }
  0x7b   : > { %v331_v25 = vrot.slane %v322_v21, %v330_v15 }
  0x7c   : > { %v345_v27 = vsel %vm319_vm0, %v327_v24, %v338_v22 }
  0x7d   : > { %v346_v28 = vsel %vm320_vm1, %v331_v25, %v342_v23 }
  0x7e   : > { %v349_v29 = vcombine.low %v345_v27, %v346_v28 }
  0x80   : > { %v356_v30 = vrot.slane %v349_v29, %v355_v26 }
  0x82   : > { %v363_v31 = vrot.slane %v356_v30, %v355_v26 }
  0x84   : > { %369 = vst.msk [vmem:[%s316_s12] ss:$8 sm:$0x3] %vm367_vm2, %v363_v31 }
  0x85 PF: > { %s965_s20 = sld [smem:[#allocation2 + $0x1]] }
  0x86   : > { %s1541_s28 = sld [smem:[#allocation7 + $0x1]] }
  0x8b   : > { %p373_p9 = scmp.ge.s32.totalorder %s965_s20, %s1512_s25  ;;  %p374_p11 = scmp.lt.s32.totalorder %s965_s20, %s1532_s26 }
  0x8d   : > { %p375_p13 = pnand %p374_p11, %p373_p9 }
  0x8e   : > { %s379_s29 = ssub.s32 (!%p375_p13), %s965_s20, %s1512_s25  ;;  %s967_s27 = sshll.u32 (!%p375_p13), %s1289_s19, 7 }
  0x8f   : > { %378 = sbr.rel (%p375_p13) target bundleno = 165 (0xa5), region = 60  ;;  %s384_s23 = sadd.s32 (!%p375_p13), 1, %s967_s27 }
  0x90   : > { %s386_s24 = sshra.s32 (!%p375_p13), %s379_s29, 3  ;;  %s385_s30 = sld [smem:[#allocation8 + %s384_s23]] (!%p375_p13) }
  0x91   : > { %s389_s8 = sand.u32 (!%p375_p13), 7, %s379_s29  ;;  %s999_s13 = sshll.u32 (!%p375_p13), %s386_s24, 4 }
  0x92   : > { %s392_s14 = sadd.s32 (!%p375_p13), %s999_s13, %s389_s8 }
  0x93   : > { %s393_s7 = scalar_lea.vmem (!%p375_p13), %s1502_s5, %s392_s14 [#allocation10]  ;;  %s395_s1 = scalar_lea.vmem (!%p375_p13), %s1514_s11, %s392_s14 [#allocation11] }
  0x94   : > { %v380_v32 = vlaneseq  ;;  %v1310_v35 = vmov 1966171168   ;;  %v394_v40 = vld [vmem:[%s393_s7] ss:$8 sm:$0x3]  ;;  %v397_v42 = vstv %s1541_s28 }
  0x95   : > { %v430_v36 = vunpack.c.l.s4 %v1310_v35  ;;  %v396_v41 = vld [vmem:[%s395_s1] ss:$8 sm:$0x3] }
  0x96   : > { %v381_v33 = vand.u32 127, %v380_v32  ;;  %v404_v34 = vshrl.u32 %v380_v32, 7  ;;  %v400_v43 = vstv %s385_s30  ;;  %vm446_vm5 = vcmp.lt.s32.totalorder %v380_v32, 256 }
  0x97   : > { %v431_v44 = vunpack.c.0.s8 %v430_v36  ;;  %v401_v45 = vadd.f32 %v400_v43, %v394_v40 }
  0x98   : > { %v382_v37 = vadd.s32 128, %v381_v33  ;;  %v405_v38 = vsub.s32 0, %v404_v34  ;;  %v409_v39 = vsub.s32 1, %v404_v34  ;;  %vm398_vm3 = vcmp.eq.s32.totalorder %v381_v33, %v397_v42 }
  0x99   : > { %v434_v50 = vsub.s32 %v431_v44, %v404_v34 }
  0x9a   : > { %v417_v46 = vrot.slane %v396_v41, %v405_v38  ;;  %v421_v47 = vrot.slane %v396_v41, %v409_v39  ;;  %vm399_vm4 = vcmp.eq.s32.totalorder %v382_v37, %v397_v42  ;;  %v406_v48 = vrot.slane %v401_v45, %v405_v38 }
  0x9b   : > { %v410_v49 = vrot.slane %v401_v45, %v409_v39 }
  0x9c   : > { %v424_v51 = vsel %vm398_vm3, %v406_v48, %v417_v46 }
  0x9d   : > { %v425_v52 = vsel %vm399_vm4, %v410_v49, %v421_v47 }
  0x9e   : > { %v428_v53 = vcombine.low %v424_v51, %v425_v52 }
  0xa0   : > { %v435_v54 = vrot.slane %v428_v53, %v434_v50 }
  0xa2   : > { %v442_v55 = vrot.slane %v435_v54, %v434_v50 }
  0xa4   : > { %448 = vst.msk [vmem:[%s395_s1] ss:$8 sm:$0x3] %vm446_vm5, %v442_v55 }
  0xa5 PF: > { %s970_s9 = sld [smem:[#allocation2 + $0x2]] }
  0xa6   : > { %s1550_s12 = sld [smem:[#allocation7 + $0x2]] }
  0xab   : > { %p452_p1 = scmp.ge.s32.totalorder %s970_s9, %s1512_s25  ;;  %p453_p2 = scmp.lt.s32.totalorder %s970_s9, %s1532_s26 }
  0xad   : > { %p454_p4 = pnand %p453_p2, %p452_p1 }
  0xae   : > { %s458_s20 = ssub.s32 (!%p454_p4), %s970_s9, %s1512_s25  ;;  %s972_s28 = sshll.u32 (!%p454_p4), %s1289_s19, 7 }
  0xaf   : > { %457 = sbr.rel (%p454_p4) target bundleno = 197 (0xc5), region = 64  ;;  %s463_s29 = sadd.s32 (!%p454_p4), 2, %s972_s28 }
  0xb0   : > { %s465_s27 = sshra.s32 (!%p454_p4), %s458_s20, 3  ;;  %s464_s23 = sld [smem:[#allocation8 + %s463_s29]] (!%p454_p4) }
  0xb1   : > { %s468_s24 = sand.u32 (!%p454_p4), 7, %s458_s20  ;;  %s1000_s30 = sshll.u32 (!%p454_p4), %s465_s27, 4 }
  0xb2   : > { %s471_s8 = sadd.s32 (!%p454_p4), %s1000_s30, %s468_s24 }
  0xb3   : > { %s472_s13 = scalar_lea.vmem (!%p454_p4), %s1502_s5, %s471_s8 [#allocation10]  ;;  %s474_s14 = scalar_lea.vmem (!%p454_p4), %s1514_s11, %s471_s8 [#allocation11] }
  0xb4   : > { %v459_v56 = vlaneseq  ;;  %v1311_v59 = vmov 1966171168   ;;  %v473_v0 = vld [vmem:[%s472_s13] ss:$8 sm:$0x3]  ;;  %v476_v2 = vstv %s1550_s12 }
  0xb5   : > { %v509_v60 = vunpack.c.l.s4 %v1311_v59  ;;  %v475_v1 = vld [vmem:[%s474_s14] ss:$8 sm:$0x3] }
  0xb6   : > { %v460_v57 = vand.u32 127, %v459_v56  ;;  %v483_v58 = vshrl.u32 %v459_v56, 7  ;;  %v479_v3 = vstv %s464_s23  ;;  %vm525_vm8 = vcmp.lt.s32.totalorder %v459_v56, 256 }
  0xb7   : > { %v510_v4 = vunpack.c.0.s8 %v509_v60  ;;  %v480_v5 = vadd.f32 %v479_v3, %v473_v0 }
  0xb8   : > { %v461_v61 = vadd.s32 128, %v460_v57  ;;  %v484_v62 = vsub.s32 0, %v483_v58  ;;  %v488_v63 = vsub.s32 1, %v483_v58  ;;  %vm477_vm6 = vcmp.eq.s32.totalorder %v460_v57, %v476_v2 }
  0xb9   : > { %v513_v10 = vsub.s32 %v510_v4, %v483_v58 }
  0xba   : > { %v496_v6 = vrot.slane %v475_v1, %v484_v62  ;;  %v500_v7 = vrot.slane %v475_v1, %v488_v63  ;;  %vm478_vm7 = vcmp.eq.s32.totalorder %v461_v61, %v476_v2  ;;  %v485_v8 = vrot.slane %v480_v5, %v484_v62 }
  0xbb   : > { %v489_v9 = vrot.slane %v480_v5, %v488_v63 }
  0xbc   : > { %v503_v11 = vsel %vm477_vm6, %v485_v8, %v496_v6 }
  0xbd   : > { %v504_v12 = vsel %vm478_vm7, %v489_v9, %v500_v7 }
  0xbe   : > { %v507_v13 = vcombine.low %v503_v11, %v504_v12 }
  0xc0   : > { %v514_v14 = vrot.slane %v507_v13, %v513_v10 }
  0xc2   : > { %v521_v15 = vrot.slane %v514_v14, %v513_v10 }
  0xc4   : > { %527 = vst.msk [vmem:[%s474_s14] ss:$8 sm:$0x3] %vm525_vm8, %v521_v15 }
  0xc5 PF: > { %s975_s7 = sld [smem:[#allocation2 + $0x3]] }
  0xc6   : > { %s1559_s1 = sld [smem:[#allocation7 + $0x3]] }
  0xcb   : > { %p531_p6 = scmp.ge.s32.totalorder %s975_s7, %s1512_s25  ;;  %p532_p8 = scmp.lt.s32.totalorder %s975_s7, %s1532_s26 }
  0xcd   : > { %p533_p10 = pnand %p532_p8, %p531_p6 }
  0xce   : > { %s537_s9 = ssub.s32 (!%p533_p10), %s975_s7, %s1512_s25  ;;  %s977_s12 = sshll.u32 (!%p533_p10), %s1289_s19, 7 }
  0xcf   : > { %536 = sbr.rel (%p533_p10) target bundleno = 229 (0xe5), region = 68  ;;  %s542_s20 = sadd.s32 (!%p533_p10), 3, %s977_s12 }
  0xd0   : > { %s544_s28 = sshra.s32 (!%p533_p10), %s537_s9, 3  ;;  %s543_s29 = sld [smem:[#allocation8 + %s542_s20]] (!%p533_p10) }
  0xd1   : > { %s547_s27 = sand.u32 (!%p533_p10), 7, %s537_s9  ;;  %s1001_s23 = sshll.u32 (!%p533_p10), %s544_s28, 4 }
  0xd2   : > { %s550_s24 = sadd.s32 (!%p533_p10), %s1001_s23, %s547_s27 }
  0xd3   : > { %s551_s30 = scalar_lea.vmem (!%p533_p10), %s1502_s5, %s550_s24 [#allocation10]  ;;  %s553_s8 = scalar_lea.vmem (!%p533_p10), %s1514_s11, %s550_s24 [#allocation11] }
  0xd4   : > { %v538_v16 = vlaneseq  ;;  %v1312_v19 = vmov 1966171168   ;;  %v552_v24 = vld [vmem:[%s551_s30] ss:$8 sm:$0x3]  ;;  %v555_v26 = vstv %s1559_s1 }
  0xd5   : > { %v588_v20 = vunpack.c.l.s4 %v1312_v19  ;;  %v554_v25 = vld [vmem:[%s553_s8] ss:$8 sm:$0x3] }
  0xd6   : > { %v539_v17 = vand.u32 127, %v538_v16  ;;  %v562_v18 = vshrl.u32 %v538_v16, 7  ;;  %v558_v27 = vstv %s543_s29  ;;  %vm604_vm11 = vcmp.lt.s32.totalorder %v538_v16, 256 }
  0xd7   : > { %v589_v28 = vunpack.c.0.s8 %v588_v20  ;;  %v559_v29 = vadd.f32 %v558_v27, %v552_v24 }
  0xd8   : > { %v540_v21 = vadd.s32 128, %v539_v17  ;;  %v563_v22 = vsub.s32 0, %v562_v18  ;;  %v567_v23 = vsub.s32 1, %v562_v18  ;;  %vm556_vm9 = vcmp.eq.s32.totalorder %v539_v17, %v555_v26 }
  0xd9   : > { %v592_v34 = vsub.s32 %v589_v28, %v562_v18 }
  0xda   : > { %v575_v30 = vrot.slane %v554_v25, %v563_v22  ;;  %v579_v31 = vrot.slane %v554_v25, %v567_v23  ;;  %vm557_vm10 = vcmp.eq.s32.totalorder %v540_v21, %v555_v26  ;;  %v564_v32 = vrot.slane %v559_v29, %v563_v22 }
  0xdb   : > { %v568_v33 = vrot.slane %v559_v29, %v567_v23 }
  0xdc   : > { %v582_v35 = vsel %vm556_vm9, %v564_v32, %v575_v30 }
  0xdd   : > { %v583_v36 = vsel %vm557_vm10, %v568_v33, %v579_v31 }
  0xde   : > { %v586_v37 = vcombine.low %v582_v35, %v583_v36 }
  0xe0   : > { %v593_v38 = vrot.slane %v586_v37, %v592_v34 }
  0xe2   : > { %v600_v39 = vrot.slane %v593_v38, %v592_v34 }
  0xe4   : > { %606 = vst.msk [vmem:[%s553_s8] ss:$8 sm:$0x3] %vm604_vm11, %v600_v39 }
  0xe5 PF: > { %s980_s13 = sld [smem:[#allocation2 + $0x4]] }
  0xe6   : > { %s1568_s14 = sld [smem:[#allocation7 + $0x4]] }
  0xeb   : > { %p610_p0 = scmp.ge.s32.totalorder %s980_s13, %s1512_s25  ;;  %p611_p3 = scmp.lt.s32.totalorder %s980_s13, %s1532_s26 }
  0xed   : > { %p612_p5 = pnand %p611_p3, %p610_p0 }
  0xee   : > { %s616_s7 = ssub.s32 (!%p612_p5), %s980_s13, %s1512_s25  ;;  %s982_s1 = sshll.u32 (!%p612_p5), %s1289_s19, 7 }
  0xef   : > { %615 = sbr.rel (%p612_p5) target bundleno = 261 (0x105), region = 72  ;;  %s621_s9 = sadd.s32 (!%p612_p5), 4, %s982_s1 }
  0xf0   : > { %s623_s12 = sshra.s32 (!%p612_p5), %s616_s7, 3  ;;  %s622_s20 = sld [smem:[#allocation8 + %s621_s9]] (!%p612_p5) }
  0xf1   : > { %s626_s28 = sand.u32 (!%p612_p5), 7, %s616_s7  ;;  %s1002_s29 = sshll.u32 (!%p612_p5), %s623_s12, 4 }
  0xf2   : > { %s629_s27 = sadd.s32 (!%p612_p5), %s1002_s29, %s626_s28 }
  0xf3   : > { %s630_s23 = scalar_lea.vmem (!%p612_p5), %s1502_s5, %s629_s27 [#allocation10]  ;;  %s632_s24 = scalar_lea.vmem (!%p612_p5), %s1514_s11, %s629_s27 [#allocation11] }
  0xf4   : > { %v617_v40 = vlaneseq  ;;  %v1313_v43 = vmov 1966171168   ;;  %v631_v48 = vld [vmem:[%s630_s23] ss:$8 sm:$0x3]  ;;  %v634_v50 = vstv %s1568_s14 }
  0xf5   : > { %v667_v44 = vunpack.c.l.s4 %v1313_v43  ;;  %v633_v49 = vld [vmem:[%s632_s24] ss:$8 sm:$0x3] }
  0xf6   : > { %v618_v41 = vand.u32 127, %v617_v40  ;;  %v641_v42 = vshrl.u32 %v617_v40, 7  ;;  %v637_v51 = vstv %s622_s20  ;;  %vm683_vm14 = vcmp.lt.s32.totalorder %v617_v40, 256 }
  0xf7   : > { %v668_v52 = vunpack.c.0.s8 %v667_v44  ;;  %v638_v53 = vadd.f32 %v637_v51, %v631_v48 }
  0xf8   : > { %v619_v45 = vadd.s32 128, %v618_v41  ;;  %v642_v46 = vsub.s32 0, %v641_v42  ;;  %v646_v47 = vsub.s32 1, %v641_v42  ;;  %vm635_vm12 = vcmp.eq.s32.totalorder %v618_v41, %v634_v50 }
  0xf9   : > { %v671_v58 = vsub.s32 %v668_v52, %v641_v42 }
  0xfa   : > { %v654_v54 = vrot.slane %v633_v49, %v642_v46  ;;  %v658_v55 = vrot.slane %v633_v49, %v646_v47  ;;  %vm636_vm13 = vcmp.eq.s32.totalorder %v619_v45, %v634_v50  ;;  %v643_v56 = vrot.slane %v638_v53, %v642_v46 }
  0xfb   : > { %v647_v57 = vrot.slane %v638_v53, %v646_v47 }
  0xfc   : > { %v661_v59 = vsel %vm635_vm12, %v643_v56, %v654_v54 }
  0xfd   : > { %v662_v60 = vsel %vm636_vm13, %v647_v57, %v658_v55 }
  0xfe   : > { %v665_v61 = vcombine.low %v661_v59, %v662_v60 }
 0x100   : > { %v672_v62 = vrot.slane %v665_v61, %v671_v58 }
 0x102   : > { %v679_v63 = vrot.slane %v672_v62, %v671_v58 }
 0x104   : > { %685 = vst.msk [vmem:[%s632_s24] ss:$8 sm:$0x3] %vm683_vm14, %v679_v63 }
 0x105 PF: > { %s985_s30 = sld [smem:[#allocation2 + $0x5]] }
 0x106   : > { %s1577_s8 = sld [smem:[#allocation7 + $0x5]] }
 0x10b   : > { %p689_p7 = scmp.ge.s32.totalorder %s985_s30, %s1512_s25  ;;  %p690_p9 = scmp.lt.s32.totalorder %s985_s30, %s1532_s26 }
 0x10d   : > { %p691_p11 = pnand %p690_p9, %p689_p7 }
 0x10e   : > { %s695_s13 = ssub.s32 (!%p691_p11), %s985_s30, %s1512_s25  ;;  %s987_s14 = sshll.u32 (!%p691_p11), %s1289_s19, 7 }
 0x10f   : > { %694 = sbr.rel (%p691_p11) target bundleno = 293 (0x125), region = 76  ;;  %s700_s7 = sadd.s32 (!%p691_p11), 5, %s987_s14 }
 0x110   : > { %s702_s1 = sshra.s32 (!%p691_p11), %s695_s13, 3  ;;  %s701_s9 = sld [smem:[#allocation8 + %s700_s7]] (!%p691_p11) }
 0x111   : > { %s705_s12 = sand.u32 (!%p691_p11), 7, %s695_s13  ;;  %s1003_s20 = sshll.u32 (!%p691_p11), %s702_s1, 4 }
 0x112   : > { %s708_s28 = sadd.s32 (!%p691_p11), %s1003_s20, %s705_s12 }
 0x113   : > { %s709_s26 = scalar_lea.vmem (!%p691_p11), %s1502_s5, %s708_s28 [#allocation10]  ;;  %s711_s29 = scalar_lea.vmem (!%p691_p11), %s1514_s11, %s708_s28 [#allocation11] }
 0x114   : > { %v696_v0 = vlaneseq  ;;  %v1314_v3 = vmov 1966171168   ;;  %v710_v8 = vld [vmem:[%s709_s26] ss:$8 sm:$0x3]  ;;  %v713_v10 = vstv %s1577_s8 }
 0x115   : > { %v746_v4 = vunpack.c.l.s4 %v1314_v3  ;;  %v712_v9 = vld [vmem:[%s711_s29] ss:$8 sm:$0x3] }
 0x116   : > { %v697_v1 = vand.u32 127, %v696_v0  ;;  %v720_v2 = vshrl.u32 %v696_v0, 7  ;;  %v716_v11 = vstv %s701_s9  ;;  %vm762_vm1 = vcmp.lt.s32.totalorder %v696_v0, 256 }
 0x117   : > { %v747_v12 = vunpack.c.0.s8 %v746_v4  ;;  %v717_v13 = vadd.f32 %v716_v11, %v710_v8 }
 0x118   : > { %v698_v5 = vadd.s32 128, %v697_v1  ;;  %v721_v6 = vsub.s32 0, %v720_v2  ;;  %v725_v7 = vsub.s32 1, %v720_v2  ;;  %vm714_vm15 = vcmp.eq.s32.totalorder %v697_v1, %v713_v10 }
 0x119   : > { %v750_v18 = vsub.s32 %v747_v12, %v720_v2 }
 0x11a   : > { %v733_v14 = vrot.slane %v712_v9, %v721_v6  ;;  %v737_v15 = vrot.slane %v712_v9, %v725_v7  ;;  %vm715_vm0 = vcmp.eq.s32.totalorder %v698_v5, %v713_v10  ;;  %v722_v16 = vrot.slane %v717_v13, %v721_v6 }
 0x11b   : > { %v726_v17 = vrot.slane %v717_v13, %v725_v7 }
 0x11c   : > { %v740_v19 = vsel %vm714_vm15, %v722_v16, %v733_v14 }
 0x11d   : > { %v741_v20 = vsel %vm715_vm0, %v726_v17, %v737_v15 }
 0x11e   : > { %v744_v21 = vcombine.low %v740_v19, %v741_v20 }
 0x120   : > { %v751_v22 = vrot.slane %v744_v21, %v750_v18 }
 0x122   : > { %v758_v23 = vrot.slane %v751_v22, %v750_v18 }
 0x124   : > { %764 = vst.msk [vmem:[%s711_s29] ss:$8 sm:$0x3] %vm762_vm1, %v758_v23 }
 0x125 PF: > { %s1004_s5 = sshll.u32 %s1285_s18, 3  ;;  %s993_s25 = sshll.u32 %s1289_s19, 5 }
 0x126   : > { %s783_s27 = sshll.u32 %s1514_s11, 4  ;;  %s780_s23 = sadd.s32 %s1004_s5, %s993_s25  ;;  %s1589_s27 = int_to_ptr.vmem [resolvable:$true] %s783_s27 }
 0x127   : > { %s994_s24 = sshll.u32 %s780_s23, 7  ;;  %s767_s14 = scalar_lea.sflag [#allocation4], %s1498_s2 }
 0x128   : > { %s1594_s13 = scalar_lea.hbm %s1651_s4, %s994_s24  ;;  %s1193_s7 = scalar_lea.vmem %s1589_s27, 1024 }
 0x129   : > { %p1194_p13 = scmp.ne.s32.totalorder %s1589_s27, %s1193_s7  ;;  %s1315_s18 = smov [#allocation11]  }
 0x12a   : > { %s1197_s19 = sshll.u32 %s1315_s18, 4  ;;  %s1198_s19 = int_to_ptr.vmem [resolvable:$false] %s1197_s19 }
 0x12b   : > { %p1195_p1 = pnand %p1194_p13, %p1449_p12  ;;  %s1199_s11 = scalar_lea.vmem %s1198_s19, 2048 }
 0x12c   : > { %p1200_p4 = scmp.lt.s32.totalorder %s1589_s27, %s1198_s19  ;;  %p1201_p6 = scmp.lt.s32.totalorder %s1199_s11, %s1193_s7 }
 0x12d   : > { %p1196_p2 = pneg %p1195_p1 }
 0x12e   : > { %p1202_p8 = por %p1201_p6, %p1200_p4 }
 0x130   : > { %p1203_p10 = pnand %p1202_p8, %p1196_p2 }
 0x132   : > { %1206 = shalt.err (!%p1203_p10)
}
 0x133   : > { %s1207_s1 = scalar_lea.hbm %s1594_s13, 1024  ;;  %s1211_s20 = scalar_lea.hbm %s1651_s4, 8192 }
 0x134   : > { %p1208_p0 = scmp.ne.s32.totalorder %s1594_s13, %s1207_s1  ;;  %p1212_p7 = scmp.lt.s32.totalorder %s1594_s13, %s1651_s4 }
 0x135   : > { %p1213_p9 = scmp.lt.s32.totalorder %s1211_s20, %s1207_s1 }
 0x136   : > { %p1209_p3 = pnand %p1208_p0, %p1449_p12 }
 0x137   : > { %p1214_p11 = por %p1213_p9, %p1212_p7 }
 0x138   : > { %p1210_p5 = pneg %p1209_p3 }
 0x13a   : > { %p1215_p13 = pnand %p1214_p11, %p1210_p5 }
 0x13c   : > { %1218 = shalt.err (!%p1215_p13)
}
 0x13d   : > { %s1316_s29 = smov 256   ;;  %s1317_s5 = smov 16  }
 0x13e   : > { %1019 = dma.vmem_to_hbm [thread:$0]  (%p1449_p12), %s1589_s27, 1024, %s1594_s13, %s767_s14, %s1316_s29, %s1316_s29, %s1317_s5  }
 0x13f PF: > { %s1681_s25 = sld [smem:[#allocation18_spill]]  ;;  %p1046_p1 = scmp.ge.s32.totalorder %s1301_s22, 2 }
 0x140   : > { %s798_s23 = sand.u32 1, %s1273_s15  }
 0x141   : > { %s799_s24 = scalar_lea.sflag [#allocation4], %s798_s23 }
 0x145   : > { %p1682_p2 = scmp.ne.s32.totalorder %s1681_s25, 0 }
 0x147   : > { %p1036_p4 = pnand %p1046_p1, %p1682_p2 }
 0x149   : > { %p1037_p6 = pneg %p1036_p4 }
 0x14b   : > { %1268 = dma.done.wait (%p1037_p6), %s799_s24, 1024  }
 0x14c   : > { %1270 = vsyncadd (%p1037_p6), %s799_s24, 4294966272  ;;  %s23_s22 = sadd.s32 1, %s1301_s22   ;;  %s1683_s18 = sld [smem:[#allocation17_spill]] }
 0x14d   : > { %p20_p8 = scmp.ge.s32.totalorder %s23_s22, 10   ;;  %s1684_s20 = sld [smem:[#allocation19_spill]] }
 0x14e   : > { %s1685_s15 = smov %s1277_s16  ;;  %s1686_s16 = smov %s1281_s17 }
 0x14f   : > { %s1687_s17 = smov %s1466_s0  ;;  %s1688_s19 = smov %s1297_s21 }
 0x150   : > { %s1689_s21 = smov %s1695_s6  ;;  %22 = sbr.rel (!%p20_p8) target bundleno = 14 (0xe), region = 131 }
 0x155   :  { %804 = vsyncpa [#allocation3], 1 }
 0x156   :  { %806 = vsyncpa [#allocation3 + $0x1], 1 }
 0x157   :  { %807 = vsyncpa [#allocation4], 1 }
 0x158   :  { %809 = vsyncpa [#allocation4 + $0x1], 1 }
 0x159   :  { %810 = vsyncpa [#allocation5], 1 }
 0x15a   :  { %812 = vsyncpa [#allocation5 + $0x1], 1 }
 0x15b   :  { %813 = vsyncpa [#allocation6], 1 }
 0x15c   :  { %815 = vsyncpa [#allocation6 + $0x1], 1 }
 0x15d   :  { %816 = vsyncpa [#allocation9], 1 }

</bundles_post_ra>
